<compile_context>
chip_gen: v6e
topology: v6e:2x2x1
jax: 0.10.0
libtpu: 0.0.40
codegen_flags: <defaults>
</compile_context>

<pallas_src>
import jax
import jax.numpy as jnp
from jax.experimental import pallas as pl
from jax.experimental.pallas import tpu as pltpu


_BLOCK_BUDGET_BYTES = 6 * 1024 * 1024     # per live x/out block (review: 4-8 MiB)
_VMEM_CAP_BYTES = 48 * 1024 * 1024        # v7x-safe cap (64 MiB physical per TC)
_SMALL_FASTPATH_BYTES = 256 * 1024        # below this, plain XLA add beats launch cost


def _build_pe(max_len: int, dim: int) -> jnp.ndarray:
    """Sinusoidal positional-encoding table matching the PyTorch buffer init."""
    position = jnp.arange(max_len, dtype=jnp.float32)[:, None]                # (max_len, 1)
    div_term = jnp.exp(jnp.arange(0, dim, 2, dtype=jnp.float32)
                       * (-jnp.log(10000.0) / dim))                           # (ceil(dim/2),)
    angles = position * div_term                                              # (max_len, ceil(dim/2))
    pe = jnp.zeros((max_len, dim), dtype=jnp.float32)
    pe = pe.at[:, 0::2].set(jnp.sin(angles))
    pe = pe.at[:, 1::2].set(jnp.cos(angles)[:, : dim // 2])                   # trim for odd dim
    return pe


def _round_down(v: int, m: int) -> int:
    return (v // m) * m


def _round_up(v: int, m: int) -> int:
    return -(-v // m) * m


def _add_pe_kernel(x_ref, pe_ref, o_ref):
    # x_ref: (tr, tn) tile of the flattened (B, S*D) input.
    # pe_ref: (1, tn) tile of the flattened positional table — broadcast over rows.
    o_ref[...] = x_ref[...] + pe_ref[...]


def positional_encoding_forward(x: jnp.ndarray, pe: jnp.ndarray, *,
                                force_pallas: bool = False) -> jnp.ndarray:
    """x: (B, S, D); pe: (max_len, D). Returns x + pe[:S][None]."""
    B, S, D = x.shape
    rows, cols = B, S * D
    dtype = x.dtype
    itemsize = jnp.dtype(dtype).itemsize
    total_bytes = rows * cols * itemsize

    pe_slice = pe[:S, :].astype(dtype)

    # Small-problem fast path: fixed pallas_call + grid-step overhead dominates.
    if not force_pallas and total_bytes < _SMALL_FASTPATH_BYTES:
        return x + pe_slice[None, :, :]

    # Lane-dense 2-D views (glue fuses under jit).
    x2 = x.reshape(rows, cols)
    pe2 = pe_slice.reshape(1, cols)

    # Sublane granule: 8 rows/vreg for f32, 16 for bf16, 32 for int8.
    row_granule = 8 * max(1, 4 // itemsize)
    padded_cols = _round_up(cols, 128)

    # Preferred layout: full-row-width stripes (one contiguous DMA slab per block;
    # pe tile loaded once, resident across the whole grid).  Fall back to column
    # tiling only when a single granule-tall full-width stripe exceeds the budget.
    rows_per_block = _round_down(_BLOCK_BUDGET_BYTES // (padded_cols * itemsize),
                                 row_granule)
    if rows_per_block >= row_granule:
        tn = cols                                              # full extent → always legal
        tr = rows if rows <= rows_per_block else rows_per_block
    else:
        # Rare: S*D so large that even an 8-row full-width stripe > budget.
        tr = rows if rows < row_granule else row_granule
        tn = max(128, _round_down(_BLOCK_BUDGET_BYTES // (row_granule * itemsize), 128))

    n_row = pl.cdiv(rows, tr)
    n_col = pl.cdiv(cols, tn)

    # Explicit VMEM limit from PADDED footprints: x + out double-buffered (4 blocks)
    # plus double-buffered pe tile, plus headroom; capped for v7x's 64 MiB physical.
    tr_pad = _round_up(tr, row_granule)
    tn_pad = _round_up(tn, 128)
    block_bytes = tr_pad * tn_pad * itemsize
    pe_block_bytes = row_granule * tn_pad * itemsize
    vmem_needed = 4 * block_bytes + 2 * pe_block_bytes
    vmem_limit = int(min(_VMEM_CAP_BYTES,
                         max(16 * 1024 * 1024, vmem_needed + 8 * 1024 * 1024)))

    cost = pl.CostEstimate(
        flops=rows * cols,                                   # one add per element
        transcendentals=0,
        bytes_accessed=(2 * rows * cols + cols) * itemsize,  # read x, write out, read pe once
    )

    out2 = pl.pallas_call(
        _add_pe_kernel,
        out_shape=jax.ShapeDtypeStruct((rows, cols), dtype),
        grid_spec=pltpu.PrefetchScalarGridSpec(
            num_scalar_prefetch=0,
            # Row tiles lead: in the common n_col == 1 case the megacore-shardable
            # leading axis has >1 program (v7x); pe block index depends only on j,
            # so with n_col == 1 the pe tile is never re-fetched.
            grid=(n_row, n_col),
            in_specs=[
                pl.BlockSpec((tr, tn), lambda i, j: (i, j)),   # x tile
                pl.BlockSpec((1, tn), lambda i, j: (0, j)),    # pe tile (row-broadcast)
            ],
            out_specs=pl.BlockSpec((tr, tn), lambda i, j: (i, j)),
        ),
        compiler_params=pltpu.CompilerParams(
            dimension_semantics=("parallel", "parallel"),
            vmem_limit_bytes=vmem_limit,
        ),
        cost_estimate=cost,
    )(x2, pe2)

    return out2.reshape(B, S, D)


if __name__ == "__main__":
    MAX_LEN = 1271
    D = 32
    pe = _build_pe(MAX_LEN, D)

    fwd = jax.jit(positional_encoding_forward, static_argnames=("force_pallas",))

    # --- small shape consistent with the module (batch=2, seq=8, dim=32) ---------
    B, S = 2, 8
    x = jax.random.normal(jax.random.PRNGKey(0), (B, S, D), dtype=jnp.float32)

    # Force the Pallas path so the kernel itself is exercised at this size.
    out = jax.block_until_ready(fwd(x, pe, force_pallas=True))
    ref = x + pe[:S, :][None, :, :]
    assert out.shape == (B, S, D)
    assert jnp.allclose(out, ref, atol=1e-6), "mismatch vs reference (small, pallas)"

    # Default path at this size is the plain-JAX fast path — check it too.
    out_fp = jax.block_until_ready(fwd(x, pe))
    assert jnp.allclose(out_fp, ref, atol=1e-6), "mismatch vs reference (small, fastpath)"

    # --- medium shape: naturally takes the kernel path, exercises row tiling + the
    #     ragged (masked) boundary block from the cdiv grid -------------------------
    B2, S2 = 256, 640
    x2 = jax.random.normal(jax.random.PRNGKey(1), (B2, S2, D), dtype=jnp.float32)
    out2 = jax.block_until_ready(fwd(x2, pe))
    ref2 = x2 + pe[:S2, :][None, :, :]
    assert out2.shape == (B2, S2, D)
    assert jnp.allclose(out2, ref2, atol=1e-6), "mismatch vs reference (medium)"

    print("KERNEL_OK")
</pallas_src>

<mosaic_0001>
module attributes {stable_mosaic.version = 11 : i64} {
  func.func @_add_pe_kernel(%arg0: i32, %arg1: i32, %arg2: memref<2x256xf32, #tpu.memory_space<vmem>>, %arg3: memref<1x256xf32, #tpu.memory_space<vmem>>, %arg4: memref<2x256xf32, #tpu.memory_space<vmem>>) attributes {dimension_semantics = [#tpu.dimension_semantics<parallel>, #tpu.dimension_semantics<parallel>], iteration_bounds = array<i64: 1, 1>, scalar_prefetch = 0 : i64, scratch_operands = 0 : i64, tpu.core_type = #tpu.core_type<tc>, window_params = [{transform_indices = @transform_0, window_bounds = array<i64: 2, 256>}, {transform_indices = @transform_1, window_bounds = array<i64: 1, 256>}, {transform_indices = @transform_2, window_bounds = array<i64: 2, 256>}]} {
    %c0 = arith.constant 0 : index
    %c0_0 = arith.constant 0 : index
    %0 = vector.load %arg2[%c0, %c0_0] : memref<2x256xf32, #tpu.memory_space<vmem>>, vector<2x256xf32>
    %c0_1 = arith.constant 0 : index
    %c0_2 = arith.constant 0 : index
    %1 = vector.load %arg3[%c0_1, %c0_2] : memref<1x256xf32, #tpu.memory_space<vmem>>, vector<1x256xf32>
    %2 = vector.broadcast %1 : vector<1x256xf32> to vector<2x256xf32>
    %3 = arith.addf %0, %2 : vector<2x256xf32>
    %c0_3 = arith.constant 0 : index
    %c0_4 = arith.constant 0 : index
    %4 = vector.load %arg4[%c0_3, %c0_4] : memref<2x256xf32, #tpu.memory_space<vmem>>, vector<2x256xf32>
    tpu.vector_store %arg4[%c0_3, %c0_4], %3 {strides = array<i32>} : memref<2x256xf32, #tpu.memory_space<vmem>>, vector<2x256xf32>,
    return
  }
  func.func @transform_0(%arg0: i32, %arg1: i32) -> (i32, i32) {
    %c0_i32 = arith.constant 0 : i32
    return %arg0, %arg1 : i32, i32
  }
  func.func @transform_1(%arg0: i32, %arg1: i32) -> (i32, i32) {
    %c0_i32 = arith.constant 0 : i32
    %c0_i32_0 = arith.constant 0 : i32
    return %c0_i32, %arg1 : i32, i32
  }
  func.func @transform_2(%arg0: i32, %arg1: i32) -> (i32, i32) {
    %c0_i32 = arith.constant 0 : i32
    return %arg0, %arg1 : i32, i32
  }
}

</mosaic_0001>

<bundles_post_ra>
// kernel: positional_encoding_forward.1
= control target key start
LH: loop header
LB: loop body
LE: loop exit
PB: predicated region body
PF: predicated region fallthrough
CT: control target
= control target key end

     0   :  { %v14_v0 = vlaneseq  ;;  %v38_v1 = vmov 1983009808   ;;  %s63_s1 = inlined_call_operand.vmem [shape: f32[1,256], index: 1, kind: input, shape index: {}]   ;;  %s64_s0 = inlined_call_operand.vmem [shape: f32[2,256], index: 0, kind: input, shape index: {}]   ;;  %s65_s2 = inlined_call_operand.vmem [shape: f32[2,256], index: 2, kind: output, shape index: {}]  }
   0x1   :  { %v24_v2 = vunpack.c.l.s4 %v38_v1  ;;  %v12_v4 = vld [vmem:[%s63_s1] sm:$0x3] }
   0x2   :  { %v15_v3 = vshrl.u32 %v14_v0, 7  ;;  %v11_v12 = vld [vmem:[%s64_s0] sm:$0xf] }
   0x3   :  { %v25_v5 = vunpack.c.0.s8 %v24_v2 }
   0x4   :  { %v16_v6 = vsub.s32 0, %v15_v3  ;;  %v20_v7 = vsub.s32 1, %v15_v3 }
   0x5   :  { %v28_v10 = vsub.s32 %v25_v5, %v15_v3 }
   0x6   :  { %v17_v8 = vrot.slane %v12_v4, %v16_v6  ;;  %v21_v9 = vrot.slane %v12_v4, %v20_v7 }
   0x8   :  { %v22_v11 = vcombine.low %v17_v8, %v21_v9 }
   0xa   :  { %v29_v13 = vrot.slane %v22_v11, %v28_v10 }
   0xc   :  { %v31_v14 = vadd.f32 %v29_v13, %v11_v12 }
   0xe   :  { %32 = vst [vmem:[%s65_s2] sm:$0xf] %v31_v14 }

</bundles_post_ra>
